<compile_context>
chip_gen: v7x
topology: tpu7x:2x2x1
jax: 0.10.0
libtpu: 0.0.40
codegen_flags: <defaults>
</compile_context>

<pallas_src>
import functools
import math

import jax
import jax.numpy as jnp
from jax import lax
from jax.experimental import pallas as pl
from jax.experimental.pallas import tpu as pltpu


def _accumulate_tile(x_ref, n_lane_chunks):
    """Sum of the 128-lane chunks of the current (TN, C, ts) tile, kept in f32
    vregs (two independent partial sums; one VMEM accumulator store later)."""
    lane = 128
    tn, c = x_ref.shape[0], x_ref.shape[1]

    if n_lane_chunks == 1:
        return x_ref[:, :, 0:lane].astype(jnp.float32)

    zero = jnp.zeros((tn, c, lane), jnp.float32)

    if n_lane_chunks <= 16:
        # Fully static unroll, alternating between two partial sums.
        a0, a1 = zero, zero
        for k in range(n_lane_chunks):
            chunk = x_ref[:, :, k * lane:(k + 1) * lane].astype(jnp.float32)
            if k % 2 == 0:
                a0 = a0 + chunk
            else:
                a1 = a1 + chunk
        return a0 + a1

    # Long chunk loops: partial unroll keeps LLO visibility without code bloat.
    n_pairs = n_lane_chunks // 2

    def body(i, carry):
        a0, a1 = carry
        base = pl.multiple_of(i * (2 * lane), 2 * lane)
        a0 = a0 + x_ref[:, :, pl.ds(base, lane)].astype(jnp.float32)
        base1 = pl.multiple_of(base + lane, lane)
        a1 = a1 + x_ref[:, :, pl.ds(base1, lane)].astype(jnp.float32)
        return a0, a1

    a0, a1 = lax.fori_loop(0, n_pairs, body, (zero, zero),
                           unroll=min(8, n_pairs))
    total = a0 + a1
    if n_lane_chunks % 2:
        total = total + x_ref[:, :, (n_lane_chunks - 1) * lane:].astype(jnp.float32)
    return total


def _regressor_kernel(x_ref, w_ref, b_ref, o_ref, acc_ref, *,
                      inv_s, n_lane_chunks):
    s = pl.program_id(1)

    # Register-local accumulation of this tile (VPU only, no XLU, no per-chunk
    # accumulator read-modify-write in VMEM).
    local = _accumulate_tile(x_ref, n_lane_chunks)

    @pl.when(s == 0)
    def _init():
        acc_ref[...] = jnp.zeros_like(acc_ref)

    acc_ref[...] += local                      # exactly one accumulator RMW / step

    @pl.when(s == pl.num_programs(1) - 1)
    def _finalize():
        # Single cross-lane reduce, fold 1/S into one scale, tiny matmul,
        # bias, sigmoid*2-1 -- all once per batch block.
        pooled = jnp.sum(acc_ref[...], axis=-1) * inv_s                # (TN, C)
        logits = jnp.dot(pooled, w_ref[...],
                         preferred_element_type=jnp.float32) + b_ref[...]
        y = jax.nn.sigmoid(logits) * 2.0 - 1.0                         # (TN, out)
        o_ref[...] = y.reshape(o_ref.shape).astype(o_ref.dtype)


def _vmem_capacity_bytes():
    try:
        return int(pltpu.get_tpu_info().vmem_capacity_bytes)
    except Exception:
        return 64 * 1024 * 1024        # conservative (v7x per-TensorCore size)


def _sublane_granule(itemsize):
    # f32 -> 8, bf16/f16 -> 16, int8/fp8 -> 32 packed sublanes.
    return 8 * max(1, 4 // max(1, itemsize))


def _choose_batch_block(n, c_eff, itemsize, budget_bytes):
    """~8 batch rows per block, minimizing batch padding, within the budget."""
    max_tn = max(1, min(8, budget_bytes // max(1, c_eff * 128 * itemsize)))
    best_tn, best_pad = 1, n
    for tn in range(1, min(max_tn, max(1, n)) + 1):
        pad = (-(-n // tn)) * tn - n
        if pad <= best_pad:                      # prefer larger tn among ties
            best_tn, best_pad = tn, pad
    return best_tn


def _choose_spatial_tile(s_padded, rows, itemsize, budget_bytes):
    """Largest 128-multiple dividing s_padded with rows*ts*itemsize <= budget."""
    max_ts = max(128, (budget_bytes // max(1, rows * itemsize)) // 128 * 128)
    best, ts = 128, 128
    limit = min(s_padded, max_ts)
    while ts <= limit:
        if s_padded % ts == 0:
            best = ts
        ts += 128
    return best


def linear_regressor_3d(x, weight, bias, num_keypoints, *,
                        spatial_tile=None, batch_block=None):
    """x: (N, C, D, H, W) with D == H == W (the module's global-pool assumption).
    weight: (C, out_dim) -- NOTE transposed vs. PyTorch fc.weight -- and
    bias: (out_dim,) with out_dim == num_keypoints * 3.
    Returns (N, num_keypoints, 3) float32."""
    N, C, D, H, W = x.shape
    assert D == H == W, "avg_pool3d(kernel_size=W) is a global pool only for cubic inputs"
    out_dim = weight.shape[1]
    assert weight.shape[0] == C
    assert out_dim == num_keypoints * 3

    S = D * H * W
    itemsize = jnp.dtype(x.dtype).itemsize
    sub = _sublane_granule(itemsize)
    c_eff = (-(-C // sub)) * sub                 # VMEM sublane-padded channel count

    vmem_cap = _vmem_capacity_bytes()
    tile_budget = vmem_cap // 4                  # double-buffered x tile <= cap/2
    vmem_limit = (vmem_cap * 3) // 4             # 96 MiB on v5e/v6e, 48 MiB on v7x

    tn = batch_block if batch_block is not None else _choose_batch_block(
        N, c_eff, itemsize, tile_budget)
    n_pad = (-(-N // tn)) * tn

    s128 = (-(-S // 128)) * 128                  # pad S to the lane width
    ts = spatial_tile if spatial_tile is not None else _choose_spatial_tile(
        s128, tn * c_eff, itemsize, tile_budget)
    assert ts % 128 == 0 and s128 % ts == 0, \
        "spatial tile must be a 128-multiple dividing the padded spatial size"

    # Zero-padding never changes the streamed sum (inv_s uses the true S);
    # padded batch rows (only possible via batch_block override) are sliced off.
    x3 = x.reshape(N, C, S)
    if n_pad != N or s128 != S:
        x3 = jnp.pad(x3, ((0, n_pad - N), (0, 0), (0, s128 - S)))

    w2 = weight.astype(jnp.float32)
    b2 = bias.reshape(1, out_dim).astype(jnp.float32)

    n_lane_chunks = ts // 128
    num_s_tiles = s128 // ts

    kernel = functools.partial(_regressor_kernel, inv_s=1.0 / S,
                               n_lane_chunks=n_lane_chunks)

    cost = pl.CostEstimate(
        flops=n_pad * C * s128 + 2 * n_pad * C * out_dim,
        transcendentals=n_pad * out_dim,
        bytes_accessed=(n_pad * C * s128 * itemsize
                        + C * out_dim * 4 + out_dim * 4 + n_pad * out_dim * 4),
    )

    out = pl.pallas_call(
        kernel,
        out_shape=jax.ShapeDtypeStruct((n_pad, 1, out_dim), jnp.float32),
        grid_spec=pltpu.PrefetchScalarGridSpec(
            num_scalar_prefetch=0,
            grid=(n_pad // tn, num_s_tiles),
            in_specs=[
                pl.BlockSpec((tn, C, ts), lambda n, s: (n, 0, s)),
                pl.BlockSpec((C, out_dim), lambda n, s: (0, 0)),
                pl.BlockSpec((1, out_dim), lambda n, s: (0, 0)),
            ],
            out_specs=pl.BlockSpec((tn, 1, out_dim), lambda n, s: (n, 0, 0)),
            scratch_shapes=[pltpu.VMEM((tn, C, 128), jnp.float32)],
        ),
        compiler_params=pltpu.CompilerParams(
            dimension_semantics=("parallel", "arbitrary"),
            vmem_limit_bytes=int(vmem_limit),
        ),
        cost_estimate=cost,
    )(x3, w2, b2)

    return out[:N, 0, :].reshape(N, num_keypoints, 3)


if __name__ == "__main__":
    key = jax.random.PRNGKey(0)
    keys = jax.random.split(key, 9)

    def make_params(kw, kb, c, out_dim):
        # LazyLinear(out_dim) materializes as Linear(c -> out_dim); deterministic
        # uniform init matching PyTorch's +/- 1/sqrt(fan_in) range.
        bound = 1.0 / jnp.sqrt(jnp.float32(c))
        w = jax.random.uniform(kw, (c, out_dim), jnp.float32, -bound, bound)
        b = jax.random.uniform(kb, (out_dim,), jnp.float32, -bound, bound)
        return w, b

    def reference(x, w, b, nk):
        n, c = x.shape[0], x.shape[1]
        pooled = x.reshape(n, c, -1).astype(jnp.float32).mean(-1)
        return (jax.nn.sigmoid(pooled @ w + b) * 2.0 - 1.0).reshape(n, nk, 3)

    # Case 1: N=2, C=4, 8^3 spatial; forced 128-wide spatial tiles so the
    # streamed multi-step S reduction (init / accumulate / finalize) runs.
    N, C, D, nk = 2, 4, 8, 4
    x = jax.random.normal(keys[0], (N, C, D, D, D), dtype=jnp.float32)
    w, b = make_params(keys[1], keys[2], C, nk * 3)
    y = linear_regressor_3d(x, w, b, nk, spatial_tile=128)
    jax.block_until_ready(y)
    assert y.shape == (N, nk, 3)
    assert jnp.allclose(y, reference(x, w, b, nk), atol=1e-5)

    # Case 2: odd batch with a batch_block override (exercises batch blocking
    # + batch padding) and 16^3 spatial with the auto tile (exercises the
    # fori_loop chunk-pair accumulation path).
    N2, C2, D2, nk2 = 3, 8, 16, 2
    x2 = jax.random.normal(keys[3], (N2, C2, D2, D2, D2), dtype=jnp.float32)
    w2, b2 = make_params(keys[4], keys[5], C2, nk2 * 3)
    y2 = linear_regressor_3d(x2, w2, b2, nk2, batch_block=2)
    jax.block_until_ready(y2)
    assert y2.shape == (N2, nk2, 3)
    assert jnp.allclose(y2, reference(x2, w2, b2, nk2), atol=1e-5)

    # Case 3: non-128-aligned spatial size (5^3 = 125 -> zero-padded to 256)
    # and tiny odd channel count; stays on the pipelined path.
    N3, C3, D3, nk3 = 2, 3, 5, 1
    x3 = jax.random.normal(keys[6], (N3, C3, D3, D3, D3), dtype=jnp.float32)
    w3, b3 = make_params(keys[7], keys[8], C3, nk3 * 3)
    y3 = linear_regressor_3d(x3, w3, b3, nk3)
    jax.block_until_ready(y3)
    assert y3.shape == (N3, nk3, 3)
    assert jnp.allclose(y3, reference(x3, w3, b3, nk3), atol=1e-5)

    print("KERNEL_OK")
</pallas_src>

<mosaic_0001>
module attributes {stable_mosaic.version = 11 : i64} {
  func.func @_regressor_kernel(%arg0: i32, %arg1: i32, %arg2: memref<2x4x128xf32, #tpu.memory_space<vmem>>, %arg3: memref<4x12xf32, #tpu.memory_space<vmem>>, %arg4: memref<1x12xf32, #tpu.memory_space<vmem>>, %arg5: memref<2x1x12xf32, #tpu.memory_space<vmem>>, %arg6: memref<2x4x128xf32, #tpu.memory_space<vmem>>) attributes {dimension_semantics = [#tpu.dimension_semantics<parallel>, #tpu.dimension_semantics<arbitrary>], iteration_bounds = array<i64: 1, 4>, scalar_prefetch = 0 : i64, scratch_operands = 1 : i64, tpu.core_type = #tpu.core_type<tc>, window_params = [{transform_indices = @transform_0, window_bounds = array<i64: 2, 4, 128>}, {pipeline_mode = #tpu.pipeline_mode<synchronous>, transform_indices = @transform_1, window_bounds = array<i64: 4, 12>}, {pipeline_mode = #tpu.pipeline_mode<synchronous>, transform_indices = @transform_2, window_bounds = array<i64: 1, 12>}, {transform_indices = @transform_3, window_bounds = array<i64: 2, 1, 12>}]} {
    %c0 = arith.constant 0 : index
    %c0_0 = arith.constant 0 : index
    %c0_1 = arith.constant 0 : index
    %0 = vector.load %arg2[%c0, %c0_0, %c0_1] : memref<2x4x128xf32, #tpu.memory_space<vmem>>, vector<2x4x128xf32>
    %c0_i32 = arith.constant 0 : i32
    %1 = arith.cmpi eq, %arg1, %c0_i32 : i32
    %2 = arith.extui %1 : i1 to i32
    %c0_i32_2 = arith.constant 0 : i32
    %3 = arith.cmpi ne, %2, %c0_i32_2 : i32
    scf.if %3 {
      %cst = arith.constant 0.000000e+00 : f32
      %10 = vector.broadcast %cst : f32 to vector<2x4x128xf32>
      %c0_10 = arith.constant 0 : index
      %c0_11 = arith.constant 0 : index
      %c0_12 = arith.constant 0 : index
      %11 = vector.load %arg6[%c0_10, %c0_11, %c0_12] : memref<2x4x128xf32, #tpu.memory_space<vmem>>, vector<2x4x128xf32>
      tpu.vector_store %arg6[%c0_10, %c0_11, %c0_12], %10 {strides = array<i32>} : memref<2x4x128xf32, #tpu.memory_space<vmem>>, vector<2x4x128xf32>,
    } else {
    }
    %c0_3 = arith.constant 0 : index
    %c0_4 = arith.constant 0 : index
    %c0_5 = arith.constant 0 : index
    %4 = vector.load %arg6[%c0_3, %c0_4, %c0_5] : memref<2x4x128xf32, #tpu.memory_space<vmem>>, vector<2x4x128xf32>
    %5 = arith.addf %4, %0 : vector<2x4x128xf32>
    %c0_6 = arith.constant 0 : index
    %c0_7 = arith.constant 0 : index
    %c0_8 = arith.constant 0 : index
    %6 = vector.load %arg6[%c0_6, %c0_7, %c0_8] : memref<2x4x128xf32, #tpu.memory_space<vmem>>, vector<2x4x128xf32>
    tpu.vector_store %arg6[%c0_6, %c0_7, %c0_8], %5 {strides = array<i32>} : memref<2x4x128xf32, #tpu.memory_space<vmem>>, vector<2x4x128xf32>,
    %c3_i32 = arith.constant 3 : i32
    %7 = arith.cmpi eq, %arg1, %c3_i32 : i32
    %8 = arith.extui %7 : i1 to i32
    %c0_i32_9 = arith.constant 0 : i32
    %9 = arith.cmpi ne, %8, %c0_i32_9 : i32
    scf.if %9 {
      %c0_10 = arith.constant 0 : index
      %c0_11 = arith.constant 0 : index
      %c0_12 = arith.constant 0 : index
      %10 = vector.load %arg6[%c0_10, %c0_11, %c0_12] : memref<2x4x128xf32, #tpu.memory_space<vmem>>, vector<2x4x128xf32>
      %cst = arith.constant dense<0.000000e+00> : vector<2x4xf32>
      %11 = vector.multi_reduction <add>, %10, %cst [2] : vector<2x4x128xf32> to vector<2x4xf32>
      %cst_13 = arith.constant 0.001953125 : f32
      %12 = vector.broadcast %cst_13 : f32 to vector<2x4xf32>
      %13 = arith.mulf %11, %12 : vector<2x4xf32>
      %c0_14 = arith.constant 0 : index
      %c0_15 = arith.constant 0 : index
      %14 = vector.load %arg3[%c0_14, %c0_15] : memref<4x12xf32, #tpu.memory_space<vmem>>, vector<4x12xf32>
      %cst_16 = arith.constant dense<0.000000e+00> : vector<2x12xf32>
      %15 = tpu.matmul %13, %14, %cst_16 {dimension_numbers = #tpu.dot_dimension_numbers<[1], [0], [0], [1], [0, 0, 1, 1], [], []>} : vector<2x4xf32>, vector<4x12xf32>, vector<2x12xf32> -> vector<2x12xf32>
      %c0_17 = arith.constant 0 : index
      %c0_18 = arith.constant 0 : index
      %16 = vector.load %arg4[%c0_17, %c0_18] : memref<1x12xf32, #tpu.memory_space<vmem>>, vector<1x12xf32>
      %17 = vector.broadcast %16 : vector<1x12xf32> to vector<2x12xf32>
      %18 = arith.addf %15, %17 : vector<2x12xf32>
      %19 = arith.negf %18 : vector<2x12xf32>
      %20 = math.exp %19 : vector<2x12xf32>
      %cst_19 = arith.constant 1.000000e+00 : f32
      %21 = vector.broadcast %cst_19 : f32 to vector<2x12xf32>
      %22 = arith.addf %21, %20 : vector<2x12xf32>
      %23 = arith.divf %21, %22 : vector<2x12xf32>
      %cst_20 = arith.constant 2.000000e+00 : f32
      %24 = vector.broadcast %cst_20 : f32 to vector<2x12xf32>
      %25 = arith.mulf %23, %24 : vector<2x12xf32>
      %cst_21 = arith.constant 1.000000e+00 : f32
      %26 = vector.broadcast %cst_21 : f32 to vector<2x12xf32>
      %27 = arith.subf %25, %26 : vector<2x12xf32>
      %28 = vector.shape_cast %27 : vector<2x12xf32> to vector<2x1x12xf32>
      %c0_22 = arith.constant 0 : index
      %c0_23 = arith.constant 0 : index
      %c0_24 = arith.constant 0 : index
      %29 = vector.load %arg5[%c0_22, %c0_23, %c0_24] : memref<2x1x12xf32, #tpu.memory_space<vmem>>, vector<2x1x12xf32>
      tpu.vector_store %arg5[%c0_22, %c0_23, %c0_24], %28 {strides = array<i32>} : memref<2x1x12xf32, #tpu.memory_space<vmem>>, vector<2x1x12xf32>,
    } else {
    }
    return
  }
  func.func @transform_0(%arg0: i32, %arg1: i32) -> (i32, i32, i32) {
    %c0_i32 = arith.constant 0 : i32
    %c0_i32_0 = arith.constant 0 : i32
    return %arg0, %c0_i32, %arg1 : i32, i32, i32
  }
  func.func @transform_1(%arg0: i32, %arg1: i32) -> (i32, i32) {
    %c0_i32 = arith.constant 0 : i32
    %c0_i32_0 = arith.constant 0 : i32
    %c0_i32_1 = arith.constant 0 : i32
    return %c0_i32, %c0_i32_0 : i32, i32
  }
  func.func @transform_2(%arg0: i32, %arg1: i32) -> (i32, i32) {
    %c0_i32 = arith.constant 0 : i32
    %c0_i32_0 = arith.constant 0 : i32
    %c0_i32_1 = arith.constant 0 : i32
    return %c0_i32, %c0_i32_0 : i32, i32
  }
  func.func @transform_3(%arg0: i32, %arg1: i32) -> (i32, i32, i32) {
    %c0_i32 = arith.constant 0 : i32
    %c0_i32_0 = arith.constant 0 : i32
    %c0_i32_1 = arith.constant 0 : i32
    return %arg0, %c0_i32, %c0_i32_0 : i32, i32, i32
  }
}

</mosaic_0001>

<bundles_post_ra>
// kernel: tpu_custom_call.1
= control target key start
LH: loop header
LB: loop body
LE: loop exit
PB: predicated region body
PF: predicated region fallthrough
CT: control target
= control target key end

     0   :  { %8 = vsyncpa [#allocation4], 0  ;;  %s944_s0 = inlined_call_operand.hbm [shape: f32[2,4,512], index: 0, kind: input, shape index: {}]   ;;  %s945_s1 = inlined_call_operand.hbm [shape: f32[4,12], index: 1, kind: input, shape index: {}]   ;;  %s946_s2 = inlined_call_operand.vmem [shape: f32[1,12], index: 2, kind: input, shape index: {}]   ;;  %s947_s3 = inlined_call_operand.hbm [shape: f32[2,1,12], index: 3, kind: output, shape index: {}]  }
   0x1   :  { %10 = vsyncpa [#allocation4 + $0x1], 0 }
   0x2   :  { %11 = vsyncpa [#allocation7], 0 }
   0x3   :  { %12 = vsyncpa [#allocation5], 0  ;;  %s750_s12 = smov 0   ;;  %s752_s13 = smov 0  }
   0x4   :  { %s754_s14 = smov 0   ;;  %s756_s15 = smov 0  }
   0x5   :  { %s758_s16 = smov 0   ;;  %s760_s17 = smov 0  }
   0x6 LB: > { %s461_s18 = sadd.s32 4294967295, %s716_s17   ;;  %s39_s19 = sadd.s32 1, %s704_s14  ;;  %s716_s17 = sphi %s760_s17, %s18_s17   ;;  %s712_s16 = sphi %s758_s16, %s967_s16   ;;  %s708_s15 = sphi %s756_s15, %s966_s15   ;;  %s704_s14 = sphi %s754_s14, %s965_s14   ;;  %s700_s13 = sphi %s752_s13, %s964_s13   ;;  %s696_s12 = sphi %s750_s12, %s963_s12  }
   0x7   : > { %p46_p0 = scmp.ne.s32.totalorder %s704_s14, %s700_s13  ;;  %p47_p1 = scmp.eq.s32.totalorder %s716_s17, 0 }
   0x8   : > { %p52_p2 = scmp.ne.s32.totalorder %s700_s13, %s696_s12  ;;  %p786_p3 = scmp.eq.s32.totalorder %s461_s18, 0 }
   0x9   : > { %p48_p4 = por %p47_p1, %p46_p0  ;;  %p462_p5 = scmp.ge.s32.totalorder %s716_s17, 1 }
   0xa   : > { %s953_s20 = scalar_select %p786_p3, 1, 0 }
   0xb   : > { %p793_p6 = por %p786_p3, %p52_p2  ;;  %p131_p7 = scmp.lt.s32.totalorder %s716_s17, 5 }
   0xc   : > { %s718_s23 = smov [#allocation6]   ;;  %p507_p10 = scmp.lt.s32.totalorder %s716_s17, 4 }
   0xd   : > { %s954_s21 = scalar_select %p793_p6, 1, 0 }
   0xe   : > { %p798_p8 = pnand %p462_p5, %p131_p7  ;;  %s144_s24 = sshll.u32 %s718_s23, 4  ;;  %s145_s24 = int_to_ptr.vmem [resolvable:$true] %s144_s24 }
   0xf   : > { %s158_s25 = sand.u32 1, %s704_s14   ;;  %p812_p12 = pnand %p507_p10, %p48_p4 }
  0x10   : > { %s955_s22 = scalar_select %p798_p8, 1, 0 }
  0x11   : > { %p498_p9 = pneg %p798_p8  ;;  %s574_s30 = scalar_lea.hbm %s945_s1, 64 }
  0x12   : > { %s957_s27 = scalar_select %p812_p12, 1, 0 }
  0x13   : > { %p808_p11 = pnand %p498_p9, %p786_p3  ;;  %p575_p13 = scmp.ne.s32.totalorder %s945_s1, %s574_s30 }
  0x14   : > { %p581_p5 = scmp.lt.u32.totalorder %s574_s30, %s945_s1 }
  0x15   : > { %p576_p0 = pneg %p808_p11 }
  0x17   : > { %p577_p1 = pnand %p576_p0, %p575_p13 }
  0x19   : > { %p578_p2 = pneg %p577_p1 }
  0x1b   : > { %p583_p4 = pnand %p581_p5, %p578_p2 }
  0x1d   : > { %586 = shalt.err (!%p583_p4)
}
  0x1e   : > { %s587_s8 = scalar_lea.vmem %s145_s24, 64  ;;  %p595_p3 = scmp.lt.s32.totalorder %s145_s24, %s145_s24 }
  0x1f   : > { %p588_p7 = scmp.ne.s32.totalorder %s145_s24, %s587_s8  ;;  %p596_p6 = scmp.lt.s32.totalorder %s587_s8, %s587_s8 }
  0x21   : > { %p590_p9 = pnand %p588_p7, %p576_p0  ;;  %p597_p8 = por %p596_p6, %p595_p3 }
  0x23   : > { %p591_p10 = pneg %p590_p9 }
  0x25   : > { %p598_p12 = pnand %p597_p8, %p591_p10 }
  0x27   : > { %601 = shalt.err (!%p598_p12)
}
  0x28   : > { %501 = dma.hbm_to_vmem [thread:$0]  (!%p808_p11), %s945_s1, 64, %s145_s24, [#allocation7]  }
  0x29   : > { %s27_s11 = sadd.s32 1, %s712_s16  ;;  %s465_s12 = sshll.u32 %s158_s25, 3 }
  0x2a   : > { %p28_p3 = scmp.ge.s32.totalorder %s27_s11, 4  ;;  %s466_s23 = sshll.u32 %s712_s16, 6 }
  0x2b   : > { %s162_s28 = scalar_lea.vmem [#allocation3], %s465_s12  ;;  %s841_s4 = scalar_lea.hbm %s944_s0, %s466_s23 }
  0x2c   : > { %s171_s26 = sshll.u32 %s162_s28, 4  ;;  %s969_s11 = smov (%p28_p3, %s27_s11), 0  ;;  %s843_s26 = int_to_ptr.vmem [resolvable:$true] %s171_s26 }
  0x2d   : > { %s35_s24 = ssub.s32 %s712_s16, %s969_s11  ;;  %s854_s6 = scalar_lea.sflag [#allocation4], %s158_s25 }
  0x2e   : > { %p37_p6 = scmp.eq.s32.totalorder %s35_s24, 0  ;;  %s602_s7 = scalar_lea.hbm %s841_s4, 128 }
  0x2f   : > { %p603_p8 = scmp.ne.s32.totalorder %s841_s4, %s602_s7  ;;  %p958_p11 = scmp.ne.s32.totalorder %s957_s27, 0 }
  0x30   : > { %s850_s5 = scalar_select %p37_p6, %s704_s14, %s39_s19  }
  0x31   : > { %p604_p12 = pneg %p958_p11  ;;  %s607_s10 = scalar_lea.hbm %s944_s0, 512 }
  0x32   : > { %p608_p1 = scmp.lt.u32.totalorder %s841_s4, %s944_s0  ;;  %p609_p2 = scmp.lt.u32.totalorder %s607_s10, %s602_s7 }
  0x33   : > { %p605_p13 = pnand %p604_p12, %p603_p8  ;;  %p611_p4 = scmp.lt.u32.totalorder %s602_s7, %s841_s4 }
  0x34   : > { %p610_p5 = por %p609_p2, %p608_p1 }
  0x35   : > { %p606_p0 = pneg %p605_p13 }
  0x36   : > { %p612_p7 = por %p611_p4, %p610_p5 }
  0x38   : > { %p613_p9 = pnand %p612_p7, %p606_p0 }
  0x3a   : > { %616 = shalt.err (!%p613_p9)
}
  0x3b   : > { %s617_s19 = scalar_lea.vmem %s843_s26, 128  ;;  %s719_s25 = smov [#allocation3]  }
  0x3c   : > { %p618_p10 = scmp.ne.s32.totalorder %s843_s26, %s617_s19  ;;  %s622_s28 = sshll.u32 %s719_s25, 4  ;;  %s623_s28 = int_to_ptr.vmem [resolvable:$false] %s622_s28 }
  0x3d   : > { %s624_s29 = scalar_lea.vmem %s623_s28, 256  ;;  %p625_p8 = scmp.lt.s32.totalorder %s843_s26, %s623_s28 }
  0x3e   : > { %p620_p3 = pnand %p618_p10, %p604_p12  ;;  %p626_p13 = scmp.lt.s32.totalorder %s624_s29, %s617_s19 }
  0x40   : > { %p621_p6 = pneg %p620_p3  ;;  %p627_p1 = por %p626_p13, %p625_p8 }
  0x42   : > { %p628_p2 = pnand %p627_p1, %p621_p6 }
  0x44   : > { %631 = shalt.err (!%p628_p2)
}
  0x45   : > { %s720_s30 = smov 256   ;;  %s721_s24 = smov 64  }
  0x46   : > { %s722_s7 = smov 4   ;;  %p959_p12 = scmp.ne.s32.totalorder %s955_s22, 0 }
  0x47   : > { %505 = dma.hbm_to_vmem [thread:$0]  (!%p958_p11), %s841_s4, 128, %s843_s26, %s854_s6, %s720_s30, %s721_s24, %s722_s7  }
  0x48   : > { %183 = sbr.rel (%p959_p12) target bundleno = 533 (0x215), region = 32  ;;  %s185_s8 = sand.u32 (!%p959_p12), 1, %s700_s13  }
  0x49   : > { %s468_s9 = sshll.u32 (!%p959_p12), %s185_s8, 3  ;;  %s186_s10 = scalar_lea.sflag (!%p959_p12), [#allocation4], %s185_s8 }
  0x4a   : > { %s189_s12 = scalar_lea.vmem (!%p959_p12), [#allocation3], %s468_s9  ;;  %p960_p0 = scmp.ne.s32.totalorder (!%p959_p12), %s954_s21, 0 }
  0x4f   : > { %683 = dma.done.wait (%p960_p0), %s186_s10, 128  }
  0x50   : > { %685 = vsyncadd (%p960_p0), %s186_s10, 4294967168  ;;  %p961_p5 = scmp.ne.s32.totalorder %s953_s20, 0 }
  0x52   : > { %687 = dma.done.wait (%p961_p5), [#allocation7], 64  }
  0x53   : > { %689 = vsyncadd (%p961_p5), [#allocation7], 4294967232  ;;  %v213_v0 = vld [vmem:[%s189_s12] sm:$0xf]  ;;  %v214_v1 = vld [vmem:[%s189_s12 + $0x4] sm:$0xf] }
  0x54   : > { %p470_p11 = scmp.ne.s32.totalorder %s708_s15, 0 }
  0x55   : > { %v723_v2 = vmov (!%p470_p11), 0.0  }
  0x56   : > { %218 = sbr.rel (%p470_p11) target bundleno = 93 (0x5d), region = 44  ;;  %219 = vst [vmem:[#allocation2] sm:$0xf] (!%p470_p11), %v723_v2  ;;  %220 = vst [vmem:[#allocation2 + $0x4] sm:$0xf] (!%p470_p11), %v723_v2 }
  0x5d PF: > { %v221_v3 = vld [vmem:[#allocation2] sm:$0xf]  ;;  %v222_v4 = vld [vmem:[#allocation2 + $0x4] sm:$0xf]  ;;  %p471_p4 = scmp.ne.s32.totalorder %s708_s15, 3 }
  0x5e   : > { %v223_v5 = vadd.f32 %v221_v3, %v213_v0  ;;  %v224_v6 = vadd.f32 %v222_v4, %v214_v1  ;;  %vm233_vm0 = vcmask (!%p471_p4), 1043456   ;;  %v242_v11 = vld [vmem:[#allocation6] sm:$0xf] (!%p471_p4)  ;;  %v724_v12 = vmov (!%p471_p4), 0.0   ;;  %v472_v24 = vld [vmem:[%s946_s2] ss:$0 sm:$0xff] (!%p471_p4) }
  0x5f   : > { %230 = sbr.rel (%p471_p4) target bundleno = 507 (0x1fb), region = 48  ;;  %483 = vmatprep.subr.mxu0 (!%p471_p4), %v724_v12  ;;  %vm725_vm1 = vmmov (!%p471_p4), 0   ;;  %v252_v13 = vlaneseq (!%p471_p4)  ;;  %vm262_vm2 = vcmask (!%p471_p4), 1041409   ;;  %vm264_vm3 = vcmask (!%p471_p4), 31744  }
  0x60   : > { %225 = vst [vmem:[#allocation2] sm:$0xf] %v223_v5  ;;  %226 = vst [vmem:[#allocation2 + $0x4] sm:$0xf] %v224_v6  ;;  %485 = vmatprep.mubr.msk.f32.mxu0 (!%p471_p4), %vm725_vm1, %v724_v12  ;;  %484 = vmatpush3.msk.msra.mxu0 (!%p471_p4), %vm233_vm0, %v242_v11  ;;  %v726_v31 = vmov (!%p471_p4), 1966171168  }
  0x61   : > { %v253_v14 = vand.u32 (!%p471_p4), 127, %v252_v13  ;;  %v255_v15 = vshrl.u32 (!%p471_p4), %v252_v13, 7  ;;  %v350_v32 = vunpack.c.l.s4 (!%p471_p4), %v726_v31  ;;  %vm373_vm4 = vcmask (!%p471_p4), 90112  }
  0x63   : > { %v256_v17 = vsub.s32 (!%p471_p4), %v253_v14, %v255_v15  ;;  %v351_v33 = vunpack.c.0.s8 (!%p471_p4), %v350_v32 }
  0x65   : > { %v354_v35 = vsub.s32 (!%p471_p4), %v351_v33, %v255_v15 }
  0x67   : > { %v231_v7 = vld [vmem:[#allocation2] sm:$0xf]  ;;  %v232_v8 = vld [vmem:[#allocation2 + $0x4] sm:$0xf] }
  0x68   : > { %v234_v9 = vsel %vm233_vm0, %v231_v7, 0.0  ;;  %v237_v10 = vsel %vm233_vm0, %v232_v8, 0.0 }
  0x69   : > { %235 = vadd.xlane.f32.xlu0 %v234_v9 }
  0x6d   : > { %238 = vadd.xlane.f32.xlu0 %v237_v10 }
  0xf6   : > { %v236_v16 = vpop.xlane.xlu0 %235 }
  0xf7   : > { %v240_v18 = vmul.f32 0.001953125, %v236_v16 }
  0xf9   : > { %v257_v21 = vrot.slane %v240_v18, %v256_v17 }
  0xfa   : > { %v239_v19 = vpop.xlane.xlu0 %238 }
  0xfb   : > { %v241_v20 = vmul.f32 0.001953125, %v239_v19 }
  0xfd   : > { %v261_v22 = vrot.slane %v241_v20, %v256_v17 }
  0xff   : > { %v263_v23 = vsel %vm262_vm2, %v261_v22, %v257_v21 }
 0x100   : > { %486 = vmatmul.mubr.msk.f32.vlgmr.msra.gmra.mrb[0].mxu0 %vm264_vm3, %v263_v23 }
 0x1d3   : > { %v336_v25 = vpop.f32.mrb[0].mxu0 }
 0x1d4   : > { %v337_v26 = vadd.f32 %v472_v24, %v336_v25  ;;  %v487_v27 = vpop.f32.mrb[1].mxu0 }
 0x1d6   : > { %v475_v28 = vmul.f32 -1.442695, %v337_v26 }
 0x1d8   : > { %570 = vpow2.f32 %v475_v28 }
 0x1e2   : > { %v571_v29 = vpop.eup %570 }
 0x1e3   : > { %v343_v30 = vadd.f32 1.0, %v571_v29 }
 0x1e5   : > { %572 = vrcp.f32 %v343_v30 }
 0x1ef   : > { %v573_v34 = vpop.eup %572 }
 0x1f0   : > { %v346_v36 = vmul.f32 2.0, %v573_v34 }
 0x1f2   : > { %v476_v37 = vadd.f32 -1.0, %v346_v36 }
 0x1f4   : > { %v355_v38 = vrot.slane %v476_v37, %v354_v35 }
 0x1f6   : > { %v356_v39 = vcombine.high %v355_v38, %v355_v38  ;;  %v363_v40 = vrot.slane %v355_v38, %v354_v35 }
 0x1f8   : > { %v370_v41 = vrot.slane %v356_v39, %v354_v35  ;;  %374 = vst.msk [vmem:[#allocation8] sm:$0x1] %vm373_vm4, %v363_v40 }
 0x1fa   : > { %375 = vst.msk [vmem:[#allocation8 + $0x1] sm:$0x1] %vm373_vm4, %v370_v41 }
 0x1fb PF: > { %p900_p7 = scmp.eq.s32.totalorder %s461_s18, 3  ;;  %s727_s22 = smov [#allocation8]  }
 0x1fc   : > { %s385_s27 = sshll.u32 %s727_s22, 4  ;;  %s386_s27 = int_to_ptr.vmem [resolvable:$true] %s385_s27 }
 0x1fd   : > { %s632_s26 = scalar_lea.vmem %s386_s27, 32  ;;  %p639_p6 = scmp.lt.s32.totalorder %s386_s27, %s386_s27 }
 0x1fe   : > { %p633_p9 = scmp.ne.s32.totalorder %s386_s27, %s632_s26  ;;  %p640_p8 = scmp.lt.s32.totalorder %s632_s26, %s632_s26 }
 0x200   : > { %p634_p10 = pnand %p633_p9, %p900_p7  ;;  %p641_p13 = por %p640_p8, %p639_p6 }
 0x202   : > { %p635_p3 = pneg %p634_p10 }
 0x204   : > { %p642_p1 = pnand %p641_p13, %p635_p3 }
 0x206   : > { %645 = shalt.err (!%p642_p1)
}
 0x207   : > { %s646_s18 = scalar_lea.hbm %s947_s3, 32 }
 0x208   : > { %p647_p2 = scmp.ne.s32.totalorder %s947_s3, %s646_s18  ;;  %p652_p5 = scmp.lt.u32.totalorder %s646_s18, %s947_s3 }
 0x20a   : > { %p648_p12 = pnand %p647_p2, %p900_p7 }
 0x20c   : > { %p649_p0 = pneg %p648_p12 }
 0x20e   : > { %p654_p11 = pnand %p652_p5, %p649_p0 }
 0x210   : > { %657 = shalt.err (!%p654_p11)
}
 0x211   : > { %s728_s29 = smov 16   ;;  %s729_s30 = smov 1  }
 0x212   : > { %495 = dma.vmem_to_hbm [thread:$0]  (%p900_p7), %s386_s27, 32, %s947_s3, [#allocation5], %s728_s29, %s728_s29, %s729_s30  }
 0x213   : > { %691 = dma.done.wait (%p900_p7), [#allocation5], 32  }
 0x214   : > { %693 = vsyncadd (%p900_p7), [#allocation5], 4294967264 }
 0x215 PF: > { %s18_s17 = sadd.s32 1, %s716_s17   ;;  %s963_s12 = smov %s700_s13 }
 0x216   : > { %p15_p4 = scmp.ge.s32.totalorder %s18_s17, 6   ;;  %s964_s13 = smov %s704_s14 }
 0x217   : > { %s965_s14 = smov %s850_s5  ;;  %s966_s15 = smov %s712_s16 }
 0x218   : > { %s967_s16 = smov %s969_s11  ;;  %17 = sbr.rel (!%p15_p4) target bundleno = 6 (0x6), region = 82 }
 0x21f   :  { %401 = vsyncpa [#allocation4], 1 }
 0x220   :  { %403 = vsyncpa [#allocation4 + $0x1], 1 }
 0x221   :  { %404 = vsyncpa [#allocation7], 1 }
 0x222   :  { %405 = vsyncpa [#allocation5], 1 }
 0x223   :  { %407 = vsyncpa [#allocation5 + $0x1], 1 }

</bundles_post_ra>
